<compile_context>
chip_gen: v6e
topology: v6e:2x2x1
jax: 0.10.0
libtpu: 0.0.40
codegen_flags: <defaults>
</compile_context>

<pallas_src>
import functools
import operator

import jax
import jax.numpy as jnp
from jax.experimental import pallas as pl
from jax.experimental.pallas import tpu as pltpu


# ---------------------------------------------------------------------------
# Kernel
# ---------------------------------------------------------------------------
def _specaug_kernel(x_ref, fidx_ref, tidx_ref, fs_ref, fe_ref, ts_ref, te_ref,
                    o_ref):
    # x_ref/o_ref : (row_tile, col_tile)            feature slab (rows = b*c)
    # fidx_ref    : (1, col_tile) int32             freq index of each column
    # tidx_ref    : (1, col_tile) int32             time index of each column
    # fs/fe_ref   : (row_tile, n_freq_masks) int32  freq mask [start, end)
    # ts/te_ref   : (row_tile, n_time_masks) int32  time mask [start, end)
    x = x_ref[...]
    fidx = fidx_ref[...]
    tidx = tidx_ref[...]
    fs = fs_ref[...]
    fe = fe_ref[...]
    ts = ts_ref[...]
    te = te_ref[...]

    terms = []
    for m in range(fs.shape[-1]):  # static, tiny unrolled loops
        s = fs[:, m:m + 1]         # (row_tile, 1) broadcast per row
        e = fe[:, m:m + 1]
        terms.append((fidx >= s) & (fidx < e))
    for m in range(ts.shape[-1]):
        s = ts[:, m:m + 1]
        e = te[:, m:m + 1]
        terms.append((tidx >= s) & (tidx < e))
    kill = functools.reduce(operator.or_, terms)

    # Single lane-dense full-tile store; every element written exactly once.
    o_ref[...] = jnp.where(kill, jnp.zeros_like(x), x)


# ---------------------------------------------------------------------------
# Wrapper helpers
# ---------------------------------------------------------------------------
def _choose_tiles(bc, tf, itemsize, budget_bytes=8 * 1024 * 1024):
    """Pick (row_tile, col_tile) for the flattened (bc, T*F) view.

    Cost model: in + out tiles, double-buffered => 4 * row * col * itemsize.
    Prefer the full lane-dense row (col_tile == T*F); only split columns (on
    multiples of 128) when an 8-row slab would not fit the VMEM budget.
    """
    per_elem = 4 * itemsize
    if 8 * tf * per_elem <= budget_bytes:
        col_tile = tf
    else:
        col_tile = max(128, ((budget_bytes // (8 * per_elem)) // 128) * 128)
        col_tile = min(col_tile, tf)

    max_rows = max(1, budget_bytes // (col_tile * per_elem))
    if max_rows >= bc:
        row_tile = bc                               # single (full) row block
    else:
        # Multiple of 8 sublanes (partial last block is handled by Pallas).
        row_tile = min(bc, max(8, (max_rows // 8) * 8))
    return row_tile, col_tile


def _draw_axis_masks(key, bc, size, mask_param, n_masks):
    """Mirror torchaudio.functional.mask_along_axis_iid bound sampling."""
    if n_masks <= 0:
        z = jnp.zeros((bc, 1), jnp.int32)           # zero-width mask => no-op
        return z, z
    kv, km = jax.random.split(key)
    value = jax.random.uniform(kv, (bc, n_masks)) * mask_param
    value = jnp.minimum(value, float(size))
    min_value = jax.random.uniform(km, (bc, n_masks)) * (size - value)
    start = min_value.astype(jnp.int32)             # floor (non-negative)
    end = start + value.astype(jnp.int32)
    return start, end


def draw_specaug_masks(key, bc, t, f, *, freq_mask_param, n_freq_masks,
                       time_mask_param, n_time_masks):
    kf, kt = jax.random.split(key)
    fstart, fend = _draw_axis_masks(kf, bc, f, freq_mask_param, n_freq_masks)
    tstart, tend = _draw_axis_masks(kt, bc, t, time_mask_param, n_time_masks)
    return fstart, fend, tstart, tend


def specaug_apply(feature, fstart, fend, tstart, tend):
    """Apply iid frequency/time masks to feature (B, C, T, F) -> same shape."""
    b, c, t, f = feature.shape
    bc = b * c
    tf = t * f
    x2 = feature.reshape(bc, tf)                    # free (contiguous) reshape

    n_fm = fstart.shape[-1]
    n_tm = tstart.shape[-1]

    # Per-column time / freq indices of the flattened minor axis.
    col = jnp.arange(tf, dtype=jnp.int32)
    tidx = (col // f).reshape(1, tf)
    fidx = (col % f).reshape(1, tf)

    row_tile, col_tile = _choose_tiles(bc, tf, x2.dtype.itemsize)
    grid = (pl.cdiv(bc, row_tile), pl.cdiv(tf, col_tile))

    n_masks_total = n_fm + n_tm
    out = pl.pallas_call(
        _specaug_kernel,
        out_shape=jax.ShapeDtypeStruct((bc, tf), x2.dtype),
        grid=grid,
        in_specs=[
            pl.BlockSpec((row_tile, col_tile), lambda i, j: (i, j)),   # x
            pl.BlockSpec((1, col_tile), lambda i, j: (0, j)),          # fidx
            pl.BlockSpec((1, col_tile), lambda i, j: (0, j)),          # tidx
            pl.BlockSpec((row_tile, n_fm), lambda i, j: (i, 0)),       # fstart
            pl.BlockSpec((row_tile, n_fm), lambda i, j: (i, 0)),       # fend
            pl.BlockSpec((row_tile, n_tm), lambda i, j: (i, 0)),       # tstart
            pl.BlockSpec((row_tile, n_tm), lambda i, j: (i, 0)),       # tend
        ],
        out_specs=pl.BlockSpec((row_tile, col_tile), lambda i, j: (i, j)),
        compiler_params=pltpu.CompilerParams(
            dimension_semantics=("parallel", "parallel")),
        cost_estimate=pl.CostEstimate(
            flops=(3 * n_masks_total + 2) * bc * tf,
            transcendentals=0,
            bytes_accessed=2 * bc * tf * x2.dtype.itemsize),
    )(x2, fidx, tidx, fstart, fend, tstart, tend)

    return out.reshape(b, c, t, f)


def specaug(feature, key, *, freq_mask_param=30, n_freq_masks=2,
            time_mask_param=40, n_time_masks=2):
    """Equivalent of SpecAug.forward on batch['feature']['data'] (B, C, T, F)."""
    # TODO(synk): time_stretch (torchaudio phase vocoder on a complex STFT) has
    # no clean Pallas equivalent and is omitted; only freq/time masking is done.
    b, c, t, f = feature.shape
    bounds = draw_specaug_masks(
        key, b * c, t, f,
        freq_mask_param=freq_mask_param, n_freq_masks=n_freq_masks,
        time_mask_param=time_mask_param, n_time_masks=n_time_masks)
    return specaug_apply(feature, *bounds)


# ---------------------------------------------------------------------------
# Pure-JAX reference (mirrors torchaudio mask_along_axis_iid application)
# ---------------------------------------------------------------------------
def _reference_apply(x4, fstart, fend, tstart, tend):
    b, c, t, f = x4.shape
    bc = b * c
    xf = x4.reshape(bc, t, f)
    fi = jnp.arange(f)[None, None, :]                               # (1,1,F)
    ti = jnp.arange(t)[None, None, :]                               # (1,1,T)
    fk = jnp.any((fi >= fstart[:, :, None]) & (fi < fend[:, :, None]),
                 axis=1)                                            # (bc, F)
    tk = jnp.any((ti >= tstart[:, :, None]) & (ti < tend[:, :, None]),
                 axis=1)                                            # (bc, T)
    kill = fk[:, None, :] | tk[:, :, None]
    return jnp.where(kill, 0.0, xf).reshape(b, c, t, f)


if __name__ == "__main__":
    key = jax.random.PRNGKey(0)
    B, C, T, F = 2, 4, 16, 16

    kx, km = jax.random.split(key)
    x = jax.random.normal(kx, (B, C, T, F), dtype=jnp.float32)

    conf = dict(freq_mask_param=8, n_freq_masks=2,
                time_mask_param=6, n_time_masks=2)

    fstart, fend, tstart, tend = draw_specaug_masks(km, B * C, T, F, **conf)

    y = specaug_apply(x, fstart, fend, tstart, tend)
    y = jax.block_until_ready(y)

    y_ref = _reference_apply(x, fstart, fend, tstart, tend)

    assert y.shape == (B, C, T, F), y.shape
    assert jnp.allclose(y, y_ref), "mismatch vs reference"
    # sanity: some elements actually got masked
    assert int(jnp.sum(y == 0.0)) > int(jnp.sum(x == 0.0))

    print("KERNEL_OK")
</pallas_src>

<mosaic_0001>
module attributes {stable_mosaic.version = 11 : i64} {
  func.func @_specaug_kernel(%arg0: i32, %arg1: i32, %arg2: memref<8x256xf32, #tpu.memory_space<vmem>>, %arg3: memref<1x256xi32, #tpu.memory_space<vmem>>, %arg4: memref<1x256xi32, #tpu.memory_space<vmem>>, %arg5: memref<8x2xi32, #tpu.memory_space<vmem>>, %arg6: memref<8x2xi32, #tpu.memory_space<vmem>>, %arg7: memref<8x2xi32, #tpu.memory_space<vmem>>, %arg8: memref<8x2xi32, #tpu.memory_space<vmem>>, %arg9: memref<8x256xf32, #tpu.memory_space<vmem>>) attributes {dimension_semantics = [#tpu.dimension_semantics<parallel>, #tpu.dimension_semantics<parallel>], iteration_bounds = array<i64: 1, 1>, scalar_prefetch = 0 : i64, scratch_operands = 0 : i64, tpu.core_type = #tpu.core_type<tc>, window_params = [{transform_indices = @transform_0, window_bounds = array<i64: 8, 256>}, {transform_indices = @transform_1, window_bounds = array<i64: 1, 256>}, {transform_indices = @transform_2, window_bounds = array<i64: 1, 256>}, {transform_indices = @transform_3, window_bounds = array<i64: 8, 2>}, {transform_indices = @transform_4, window_bounds = array<i64: 8, 2>}, {transform_indices = @transform_5, window_bounds = array<i64: 8, 2>}, {transform_indices = @transform_6, window_bounds = array<i64: 8, 2>}, {transform_indices = @transform_7, window_bounds = array<i64: 8, 256>}]} {
    %c0 = arith.constant 0 : index
    %c0_0 = arith.constant 0 : index
    %0 = vector.load %arg2[%c0, %c0_0] : memref<8x256xf32, #tpu.memory_space<vmem>>, vector<8x256xf32>
    %c0_1 = arith.constant 0 : index
    %c0_2 = arith.constant 0 : index
    %1 = vector.load %arg3[%c0_1, %c0_2] : memref<1x256xi32, #tpu.memory_space<vmem>>, vector<1x256xi32>
    %c0_3 = arith.constant 0 : index
    %c0_4 = arith.constant 0 : index
    %2 = vector.load %arg4[%c0_3, %c0_4] : memref<1x256xi32, #tpu.memory_space<vmem>>, vector<1x256xi32>
    %c0_5 = arith.constant 0 : index
    %c0_6 = arith.constant 0 : index
    %3 = vector.load %arg5[%c0_5, %c0_6] : memref<8x2xi32, #tpu.memory_space<vmem>>, vector<8x2xi32>
    %c0_7 = arith.constant 0 : index
    %c0_8 = arith.constant 0 : index
    %4 = vector.load %arg6[%c0_7, %c0_8] : memref<8x2xi32, #tpu.memory_space<vmem>>, vector<8x2xi32>
    %c0_9 = arith.constant 0 : index
    %c0_10 = arith.constant 0 : index
    %5 = vector.load %arg7[%c0_9, %c0_10] : memref<8x2xi32, #tpu.memory_space<vmem>>, vector<8x2xi32>
    %c0_11 = arith.constant 0 : index
    %c0_12 = arith.constant 0 : index
    %6 = vector.load %arg8[%c0_11, %c0_12] : memref<8x2xi32, #tpu.memory_space<vmem>>, vector<8x2xi32>
    %7 = vector.extract_strided_slice %3 {offsets = [0, 0], sizes = [8, 1], strides = [1, 1]} : vector<8x2xi32> to vector<8x1xi32>
    %8 = vector.extract_strided_slice %4 {offsets = [0, 0], sizes = [8, 1], strides = [1, 1]} : vector<8x2xi32> to vector<8x1xi32>
    %9 = vector.broadcast %1 : vector<1x256xi32> to vector<8x256xi32>
    %10 = vector.broadcast %7 : vector<8x1xi32> to vector<8x256xi32>
    %11 = arith.cmpi sge, %9, %10 : vector<8x256xi32>
    %12 = vector.broadcast %1 : vector<1x256xi32> to vector<8x256xi32>
    %13 = vector.broadcast %8 : vector<8x1xi32> to vector<8x256xi32>
    %14 = arith.cmpi slt, %12, %13 : vector<8x256xi32>
    %15 = arith.andi %11, %14 : vector<8x256xi1>
    %16 = vector.extract_strided_slice %3 {offsets = [0, 1], sizes = [8, 1], strides = [1, 1]} : vector<8x2xi32> to vector<8x1xi32>
    %17 = vector.extract_strided_slice %4 {offsets = [0, 1], sizes = [8, 1], strides = [1, 1]} : vector<8x2xi32> to vector<8x1xi32>
    %18 = vector.broadcast %1 : vector<1x256xi32> to vector<8x256xi32>
    %19 = vector.broadcast %16 : vector<8x1xi32> to vector<8x256xi32>
    %20 = arith.cmpi sge, %18, %19 : vector<8x256xi32>
    %21 = vector.broadcast %1 : vector<1x256xi32> to vector<8x256xi32>
    %22 = vector.broadcast %17 : vector<8x1xi32> to vector<8x256xi32>
    %23 = arith.cmpi slt, %21, %22 : vector<8x256xi32>
    %24 = arith.andi %20, %23 : vector<8x256xi1>
    %25 = vector.extract_strided_slice %5 {offsets = [0, 0], sizes = [8, 1], strides = [1, 1]} : vector<8x2xi32> to vector<8x1xi32>
    %26 = vector.extract_strided_slice %6 {offsets = [0, 0], sizes = [8, 1], strides = [1, 1]} : vector<8x2xi32> to vector<8x1xi32>
    %27 = vector.broadcast %2 : vector<1x256xi32> to vector<8x256xi32>
    %28 = vector.broadcast %25 : vector<8x1xi32> to vector<8x256xi32>
    %29 = arith.cmpi sge, %27, %28 : vector<8x256xi32>
    %30 = vector.broadcast %2 : vector<1x256xi32> to vector<8x256xi32>
    %31 = vector.broadcast %26 : vector<8x1xi32> to vector<8x256xi32>
    %32 = arith.cmpi slt, %30, %31 : vector<8x256xi32>
    %33 = arith.andi %29, %32 : vector<8x256xi1>
    %34 = vector.extract_strided_slice %5 {offsets = [0, 1], sizes = [8, 1], strides = [1, 1]} : vector<8x2xi32> to vector<8x1xi32>
    %35 = vector.extract_strided_slice %6 {offsets = [0, 1], sizes = [8, 1], strides = [1, 1]} : vector<8x2xi32> to vector<8x1xi32>
    %36 = vector.broadcast %2 : vector<1x256xi32> to vector<8x256xi32>
    %37 = vector.broadcast %34 : vector<8x1xi32> to vector<8x256xi32>
    %38 = arith.cmpi sge, %36, %37 : vector<8x256xi32>
    %39 = vector.broadcast %2 : vector<1x256xi32> to vector<8x256xi32>
    %40 = vector.broadcast %35 : vector<8x1xi32> to vector<8x256xi32>
    %41 = arith.cmpi slt, %39, %40 : vector<8x256xi32>
    %42 = arith.andi %38, %41 : vector<8x256xi1>
    %43 = arith.ori %15, %24 : vector<8x256xi1>
    %44 = arith.ori %43, %33 : vector<8x256xi1>
    %45 = arith.ori %44, %42 : vector<8x256xi1>
    %cst = arith.constant 0.000000e+00 : f32
    %46 = vector.broadcast %cst : f32 to vector<8x256xf32>
    %47 = arith.select %45, %46, %0 : vector<8x256xi1>, vector<8x256xf32>
    %c0_13 = arith.constant 0 : index
    %c0_14 = arith.constant 0 : index
    %48 = vector.load %arg9[%c0_13, %c0_14] : memref<8x256xf32, #tpu.memory_space<vmem>>, vector<8x256xf32>
    tpu.vector_store %arg9[%c0_13, %c0_14], %47 {strides = array<i32>} : memref<8x256xf32, #tpu.memory_space<vmem>>, vector<8x256xf32>,
    return
  }
  func.func @transform_0(%arg0: i32, %arg1: i32) -> (i32, i32) {
    %c0_i32 = arith.constant 0 : i32
    return %arg0, %arg1 : i32, i32
  }
  func.func @transform_1(%arg0: i32, %arg1: i32) -> (i32, i32) {
    %c0_i32 = arith.constant 0 : i32
    %c0_i32_0 = arith.constant 0 : i32
    return %c0_i32, %arg1 : i32, i32
  }
  func.func @transform_2(%arg0: i32, %arg1: i32) -> (i32, i32) {
    %c0_i32 = arith.constant 0 : i32
    %c0_i32_0 = arith.constant 0 : i32
    return %c0_i32, %arg1 : i32, i32
  }
  func.func @transform_3(%arg0: i32, %arg1: i32) -> (i32, i32) {
    %c0_i32 = arith.constant 0 : i32
    %c0_i32_0 = arith.constant 0 : i32
    return %arg0, %c0_i32 : i32, i32
  }
  func.func @transform_4(%arg0: i32, %arg1: i32) -> (i32, i32) {
    %c0_i32 = arith.constant 0 : i32
    %c0_i32_0 = arith.constant 0 : i32
    return %arg0, %c0_i32 : i32, i32
  }
  func.func @transform_5(%arg0: i32, %arg1: i32) -> (i32, i32) {
    %c0_i32 = arith.constant 0 : i32
    %c0_i32_0 = arith.constant 0 : i32
    return %arg0, %c0_i32 : i32, i32
  }
  func.func @transform_6(%arg0: i32, %arg1: i32) -> (i32, i32) {
    %c0_i32 = arith.constant 0 : i32
    %c0_i32_0 = arith.constant 0 : i32
    return %arg0, %c0_i32 : i32, i32
  }
  func.func @transform_7(%arg0: i32, %arg1: i32) -> (i32, i32) {
    %c0_i32 = arith.constant 0 : i32
    return %arg0, %arg1 : i32, i32
  }
}

</mosaic_0001>

<bundles_post_ra>
// kernel: tpu_custom_call.1
= control target key start
LH: loop header
LB: loop body
LE: loop exit
PB: predicated region body
PF: predicated region fallthrough
CT: control target
= control target key end

     0   :  { %v153_v1 = vmov 1   ;;  %v154_v2 = vmov 0   ;;  %s247_s0 = inlined_call_operand.vmem [shape: f32[8,256], index: 0, kind: input, shape index: {}]   ;;  %s248_s1 = inlined_call_operand.vmem [shape: s32[1,256], index: 1, kind: input, shape index: {}]   ;;  %s249_s2 = inlined_call_operand.vmem [shape: s32[1,256], index: 2, kind: input, shape index: {}]   ;;  %s250_s3 = inlined_call_operand.vmem [shape: s32[8,2], index: 3, kind: input, shape index: {}]   ;;  %s251_s4 = inlined_call_operand.vmem [shape: s32[8,2], index: 4, kind: input, shape index: {}]   ;;  %s252_s5 = inlined_call_operand.vmem [shape: s32[8,2], index: 5, kind: input, shape index: {}]   ;;  %s253_s6 = inlined_call_operand.vmem [shape: s32[8,2], index: 6, kind: input, shape index: {}]   ;;  %s254_s7 = inlined_call_operand.hbm [shape: f32[8,256], index: 7, kind: output, shape index: {}]  }
   0x1   :  { %v31_v0 = vld [vmem:[%s250_s3] sm:$0xff]  ;;  %127 = vset.pattern.permute.xlu1 %v153_v1  ;;  %126 = vset.pattern.permute.xlu0 %v154_v2 }
   0x2   :  { %12 = vsyncpa [#allocation3], 0  ;;  %56 = vperm.xlu1 %127, %v31_v0   ;;  %44 = vperm.xlu0 %126, %v31_v0   ;;  %v32_v3 = vld [vmem:[%s251_s4] sm:$0xff]  ;;  %v35_v6 = vlaneseq  ;;  %s155_s9 = smov [#allocation2]   ;;  %v28_v29 = vld [vmem:[%s247_s0 + $0x8] sm:$0xff] }
   0x3   :  { %v33_v4 = vld [vmem:[%s252_s5] sm:$0xff]  ;;  %s115_s10 = sshll.u32 %s155_s9, 4  ;;  %s116_s10 = int_to_ptr.vmem [resolvable:$true] %s115_s10 }
   0x4   :  { %v34_v5 = vld [vmem:[%s253_s6] sm:$0xff]  ;;  %v36_v7 = vshrl.u32 %v35_v6, 7  ;;  %s131_s13 = scalar_lea.vmem %s116_s10, 256  ;;  %p136_p1 = scmp.lt.s32.totalorder %s116_s10, %s116_s10 }
   0x5   :  { %v29_v10 = vld [vmem:[%s248_s1] sm:$0x3]  ;;  %p132_p0 = scmp.ne.s32.totalorder %s116_s10, %s131_s13  ;;  %p137_p2 = scmp.lt.s32.totalorder %s131_s13, %s131_s13 }
   0x6   :  { %61 = vperm.xlu1 %127, %v32_v3   ;;  %49 = vperm.xlu0 %126, %v32_v3   ;;  %v37_v8 = vsub.s32 0, %v36_v7  ;;  %v41_v9 = vsub.s32 1, %v36_v7  ;;  %v30_v14 = vld [vmem:[%s249_s2] sm:$0x3] }
   0x7   :  { %v27_v28 = vld [vmem:[%s247_s0] sm:$0xff]  ;;  %p138_p3 = por %p137_p2, %p136_p1 }
   0x8   :  { %v38_v13 = vrot.slane %v29_v10, %v37_v8  ;;  %v42_v15 = vrot.slane %v29_v10, %v41_v9  ;;  %v70_v18 = vrot.slane %v30_v14, %v37_v8  ;;  %v74_v20 = vrot.slane %v30_v14, %v41_v9 }
   0x9   :  { %p139_p4 = pnand %p138_p3, %p132_p0 }
   0xa   :  { %128 = vset.pattern.permute.xlu1 %v154_v2  ;;  %76 = vperm.xlu0 %126, %v33_v4  }
   0xb   :  { %81 = vperm.xlu1 %128, %v34_v5  }
   0xe   :  { %129 = vset.pattern.permute.xlu0 %v153_v1 }
   0xf   :  { %130 = vset.pattern.permute.xlu1 %v153_v1  ;;  %88 = vperm.xlu0 %129, %v33_v4  }
  0x10   :  { %93 = vperm.xlu1 %130, %v34_v5  }
  0x7d   :  { %v57_v11 = vpop.permute.xlu1 %56  ;;  %v45_v12 = vpop.permute.xlu0 %44 }
  0x7e   :  { %vm58_vm0 = vcmp.ge.s32.totalorder %v38_v13, %v57_v11  ;;  %vm59_vm4 = vcmp.ge.s32.totalorder %v42_v15, %v57_v11  ;;  %vm46_vm7 = vcmp.ge.s32.totalorder %v38_v13, %v45_v12  ;;  %vm47_vm9 = vcmp.ge.s32.totalorder %v42_v15, %v45_v12 }
  0x81   :  { %v62_v16 = vpop.permute.xlu1 %61  ;;  %v50_v17 = vpop.permute.xlu0 %49 }
  0x82   :  { %vm63_vm1 = vcmp.lt.s32.totalorder %v38_v13, %v62_v16  ;;  %vm64_vm2 = vcmp.lt.s32.totalorder %v42_v15, %v62_v16  ;;  %vm51_vm3 = vcmp.lt.s32.totalorder %v38_v13, %v50_v17  ;;  %vm52_vm6 = vcmp.lt.s32.totalorder %v42_v15, %v50_v17 }
  0x83   :  { %vm214_vm5 = vmand %vm58_vm0, %vm63_vm1 }
  0x84   :  { %vm218_vm8 = vmand %vm59_vm4, %vm64_vm2 }
  0x85   :  { %vm222_vm10 = vmand %vm46_vm7, %vm51_vm3  ;;  %v77_v23 = vpop.permute.xlu0 %76 }
  0x86   :  { %vm226_vm11 = vmand %vm47_vm9, %vm52_vm6  ;;  %vm78_vm12 = vcmp.ge.s32.totalorder %v70_v18, %v77_v23  ;;  %v82_v25 = vpop.permute.xlu1 %81  ;;  %vm79_vm14 = vcmp.ge.s32.totalorder %v74_v20, %v77_v23 }
  0x87   :  { %vm99_vm13 = vmor %vm222_vm10, %vm214_vm5  ;;  %vm83_vm15 = vcmp.lt.s32.totalorder %v70_v18, %v82_v25  ;;  %vm84_vm0 = vcmp.lt.s32.totalorder %v74_v20, %v82_v25 }
  0x88   :  { %vm100_vm1 = vmor %vm226_vm11, %vm218_vm8 }
  0x89   :  { %vm85_vm2 = vmand %vm78_vm12, %vm83_vm15 }
  0x8a   :  { %vm86_vm3 = vmand %vm79_vm14, %vm84_vm0  ;;  %v89_v26 = vpop.permute.xlu0 %88 }
  0x8b   :  { %v94_v27 = vpop.permute.xlu1 %93  ;;  %vm90_vm4 = vcmp.ge.s32.totalorder %v70_v18, %v89_v26  ;;  %vm91_vm6 = vcmp.ge.s32.totalorder %v74_v20, %v89_v26  ;;  %vm101_vm7 = vmor %vm99_vm13, %vm85_vm2 }
  0x8c   :  { %vm95_vm9 = vcmp.lt.s32.totalorder %v70_v18, %v94_v27  ;;  %vm96_vm5 = vcmp.lt.s32.totalorder %v74_v20, %v94_v27  ;;  %vm102_vm10 = vmor %vm100_vm1, %vm86_vm3 }
  0x8d   :  { %vm97_vm8 = vmand %vm90_vm4, %vm95_vm9 }
  0x8e   :  { %vm98_vm11 = vmand %vm91_vm6, %vm96_vm5 }
  0x8f   :  { %vm103_vm12 = vmor %vm101_vm7, %vm97_vm8 }
  0x90   :  { %vm104_vm14 = vmor %vm102_vm10, %vm98_vm11  ;;  %v105_v30 = vsel %vm103_vm12, 0.0, %v27_v28 }
  0x91   :  { %v106_v31 = vsel %vm104_vm14, 0.0, %v28_v29  ;;  %107 = vst [vmem:[#allocation2] sm:$0xff] %v105_v30 }
  0x92   :  { %108 = vst [vmem:[#allocation2 + $0x8] sm:$0xff] %v106_v31 }
  0x93   :  { %142 = shalt.err (!%p139_p4)
}
  0x94   :  { %118 = dma.vmem_to_hbm [thread:$0]  %s116_s10, 256, %s254_s7, [#allocation3]  }
  0x95   :  { %151 = dma.done.wait [#allocation3], 256  }
  0x96   :  { %152 = vsyncadd [#allocation3], 4294967040 }
  0x97   :  { %122 = vsyncpa [#allocation3], 1 }

</bundles_post_ra>
